<compile_context>
chip_gen: v7x
topology: tpu7x:2x2x1
jax: 0.10.0
libtpu: 0.0.40
codegen_flags: <defaults>
</compile_context>

<pallas_src>
import functools

import jax
import jax.numpy as jnp
from jax.experimental import pallas as pl
from jax.experimental.pallas import tpu as pltpu


def _round_up(a, b):
    return ((a + b - 1) // b) * b


def _mlp_kernel(x_ref, wa_ref, ba_ref, wb_ref, bb_ref, w3_ref, o_ref):
    # x is DMA'd as f32 (avoids an extra wrapper-side HBM pass); cast to bf16
    # on the VPU so all three matmuls run as native bf16 MXU passes.
    x = x_ref[...].astype(jnp.bfloat16)
    # Fused Linear(F,128) o Linear(128,64) o BN(64), then ReLU (f32 elementwise).
    h = jnp.dot(x, wa_ref[...], preferred_element_type=jnp.float32)
    h = jnp.maximum(h + ba_ref[...], 0.0)
    # Linear(64,32) o BN(32), then ReLU.
    h = jnp.dot(h.astype(jnp.bfloat16), wb_ref[...],
                preferred_element_type=jnp.float32)
    h = jnp.maximum(h + bb_ref[...], 0.0)
    # Risk head (bias-free), zero-padded to 8 output columns (narrow slab).
    o_ref[...] = jnp.dot(h.astype(jnp.bfloat16), w3_ref[...],
                         preferred_element_type=jnp.float32)


def _fuse_params(params):
    """Fold the first two linears together and fold eval-mode BatchNorms.

    All fusion math is exact and done in f32; only the final fused matmul
    operands are cast to bf16 for the MXU.
    """
    eps = 1e-5
    s1 = params["bn1_gamma"] / jnp.sqrt(params["bn1_var"] + eps)
    t1 = params["bn1_beta"] - params["bn1_mean"] * s1
    s2 = params["bn2_gamma"] / jnp.sqrt(params["bn2_var"] + eps)
    t2 = params["bn2_beta"] - params["bn2_mean"] * s2

    # Linear0 o Linear1 o BN1  ->  x @ WA + bA
    w01 = jnp.dot(params["w0"], params["w1"],
                  preferred_element_type=jnp.float32)          # (F, 64)
    b01 = jnp.dot(params["b0"], params["w1"],
                  preferred_element_type=jnp.float32) + params["b1"]
    wa = (w01 * s1[None, :]).astype(jnp.bfloat16)              # (F, 64) bf16
    ba = (b01 * s1 + t1).reshape(1, -1)                        # (1, 64) f32

    # Linear2 o BN2  ->  h @ WB + bB
    wb = (params["w2"] * s2[None, :]).astype(jnp.bfloat16)     # (64, 32) bf16
    bb = (params["b2"] * s2 + t2).reshape(1, -1)               # (1, 32) f32

    # Narrow head: pad (32, bins) -> (32, 8) with zeros (8-column out slab).
    w3 = params["w3"]
    hidden, bins = w3.shape
    bins_pad = _round_up(max(bins, 1), 8)
    w3p = jnp.zeros((hidden, bins_pad), jnp.float32).at[:, :bins].set(w3)
    w3p = w3p.astype(jnp.bfloat16)                             # (32, 8) bf16
    return wa, ba, wb, bb, w3p, bins


@functools.partial(jax.jit, static_argnames=("tile_n",))
def he_surv_forward(x, params, *, tile_n=4096):
    """x: (N, HE_features_num) float32. Returns (N, surv_bins) float32."""
    n, f = x.shape
    wa, ba, wb, bb, w3p, bins = _fuse_params(params)
    bins_pad = w3p.shape[1]

    # --- Row tiling ---------------------------------------------------------
    n_pad8 = _round_up(max(n, 8), 8)

    # VMEM budget for the double-buffered x (f32) + out (f32) row blocks.
    bytes_per_row = 2 * (f * 4) + 2 * (bins_pad * 4)
    row_cap = max(8, ((24 * 1024 * 1024) // bytes_per_row) // 8 * 8)
    tile = min(tile_n, n_pad8, row_cap)

    # Keep grid >= 2 whenever possible so both v7x TensorCores get work.
    if n_pad8 >= 16:
        tile = min(tile, _round_up(pl.cdiv(n_pad8, 2), 8))

    # Split rows evenly across grid steps: at most a few rows of padding,
    # and no pad / copy of x at all when the split is exact.
    grid_n = pl.cdiv(n_pad8, tile)
    tile = _round_up(pl.cdiv(n_pad8, grid_n), 8)
    n_pad = grid_n * tile
    if n_pad != n:
        x = jnp.pad(x, ((0, n_pad - n), (0, 0)))

    resident = lambda shape: pl.BlockSpec(shape, lambda i: (0, 0))
    out = pl.pallas_call(
        _mlp_kernel,
        out_shape=jax.ShapeDtypeStruct((n_pad, bins_pad), jnp.float32),
        grid=(grid_n,),
        in_specs=[
            pl.BlockSpec((tile, f), lambda i: (i, 0)),   # x row tile (f32)
            resident(wa.shape),                          # (F, 64)  bf16
            resident(ba.shape),                          # (1, 64)  f32
            resident(wb.shape),                          # (64, 32) bf16
            resident(bb.shape),                          # (1, 32)  f32
            resident(w3p.shape),                         # (32, 8)  bf16
        ],
        out_specs=pl.BlockSpec((tile, bins_pad), lambda i: (i, 0)),
        compiler_params=pltpu.CompilerParams(
            dimension_semantics=("parallel",),
            vmem_limit_bytes=32 * 1024 * 1024,
        ),
    )(x, wa, ba, wb, bb, w3p)

    return out[:n, :bins]


def init_params(key, he_features_num, he_dim_target=128, surv_mlp=(64, 32),
                surv_bins=4):
    """Deterministic PyTorch-default-style init (uniform +/- 1/sqrt(fan_in))."""
    dims_in = (he_features_num, he_dim_target, surv_mlp[0], surv_mlp[1])
    dims_out = (he_dim_target, surv_mlp[0], surv_mlp[1], surv_bins)
    keys = jax.random.split(key, 8)
    params = {}
    for i, (din, dout) in enumerate(zip(dims_in, dims_out)):
        bound = 1.0 / jnp.sqrt(float(din))
        params[f"w{i}"] = jax.random.uniform(
            keys[2 * i], (din, dout), jnp.float32, -bound, bound)
        if i < 3:  # last layer is bias-free
            params[f"b{i}"] = jax.random.uniform(
                keys[2 * i + 1], (dout,), jnp.float32, -bound, bound)
    # BatchNorm1d defaults: gamma=1, beta=0, running_mean=0, running_var=1.
    for tag, d in (("bn1", surv_mlp[0]), ("bn2", surv_mlp[1])):
        params[f"{tag}_gamma"] = jnp.ones((d,), jnp.float32)
        params[f"{tag}_beta"] = jnp.zeros((d,), jnp.float32)
        params[f"{tag}_mean"] = jnp.zeros((d,), jnp.float32)
        params[f"{tag}_var"] = jnp.ones((d,), jnp.float32)
    return params


def _reference(x, params):
    """Pure-JAX f32 reference of the (un-fused) eval-mode forward."""
    eps = 1e-5
    h = x @ params["w0"] + params["b0"]
    h = h @ params["w1"] + params["b1"]
    s1 = params["bn1_gamma"] / jnp.sqrt(params["bn1_var"] + eps)
    h = (h - params["bn1_mean"]) * s1 + params["bn1_beta"]
    h = jnp.maximum(h, 0.0)
    h = h @ params["w2"] + params["b2"]
    s2 = params["bn2_gamma"] / jnp.sqrt(params["bn2_var"] + eps)
    h = (h - params["bn2_mean"]) * s2 + params["bn2_beta"]
    h = jnp.maximum(h, 0.0)
    return h @ params["w3"]


if __name__ == "__main__":
    key = jax.random.PRNGKey(0)
    k_x, k_p = jax.random.split(key)

    N = 8                     # number of samples (HE_data.HE_features rows)
    HE_FEATURES_NUM = 32      # input HE feature dimension
    x = jax.random.normal(k_x, (N, HE_FEATURES_NUM), dtype=jnp.float32)

    params = init_params(k_p, HE_FEATURES_NUM)

    out = he_surv_forward(x, params)
    out = jax.block_until_ready(out)
    assert out.shape == (N, 4) and out.dtype == jnp.float32

    ref = _reference(x, params)
    assert jnp.allclose(out, ref, rtol=5e-2, atol=5e-2), "mismatch vs reference"
    print("KERNEL_OK")
</pallas_src>

<mosaic_0001>
module attributes {stable_mosaic.version = 11 : i64} {
  func.func @_mlp_kernel(%arg0: i32, %arg1: memref<8x32xf32, #tpu.memory_space<vmem>>, %arg2: memref<32x64xbf16, #tpu.memory_space<vmem>>, %arg3: memref<1x64xf32, #tpu.memory_space<vmem>>, %arg4: memref<64x32xbf16, #tpu.memory_space<vmem>>, %arg5: memref<1x32xf32, #tpu.memory_space<vmem>>, %arg6: memref<32x8xbf16, #tpu.memory_space<vmem>>, %arg7: memref<8x8xf32, #tpu.memory_space<vmem>>) attributes {dimension_semantics = [#tpu.dimension_semantics<parallel>], iteration_bounds = array<i64: 1>, scalar_prefetch = 0 : i64, scratch_operands = 0 : i64, tpu.core_type = #tpu.core_type<tc>, window_params = [{transform_indices = @transform_0, window_bounds = array<i64: 8, 32>}, {pipeline_mode = #tpu.pipeline_mode<synchronous>, transform_indices = @transform_1, window_bounds = array<i64: 32, 64>}, {pipeline_mode = #tpu.pipeline_mode<synchronous>, transform_indices = @transform_2, window_bounds = array<i64: 1, 64>}, {pipeline_mode = #tpu.pipeline_mode<synchronous>, transform_indices = @transform_3, window_bounds = array<i64: 64, 32>}, {pipeline_mode = #tpu.pipeline_mode<synchronous>, transform_indices = @transform_4, window_bounds = array<i64: 1, 32>}, {pipeline_mode = #tpu.pipeline_mode<synchronous>, transform_indices = @transform_5, window_bounds = array<i64: 32, 8>}, {transform_indices = @transform_6, window_bounds = array<i64: 8, 8>}]} {
    %c0 = arith.constant 0 : index
    %c0_0 = arith.constant 0 : index
    %0 = vector.load %arg1[%c0, %c0_0] : memref<8x32xf32, #tpu.memory_space<vmem>>, vector<8x32xf32>
    %1 = arith.truncf %0 : vector<8x32xf32> to vector<8x32xbf16>
    %c0_1 = arith.constant 0 : index
    %c0_2 = arith.constant 0 : index
    %2 = vector.load %arg2[%c0_1, %c0_2] : memref<32x64xbf16, #tpu.memory_space<vmem>>, vector<32x64xbf16>
    %cst = arith.constant dense<0.000000e+00> : vector<8x64xf32>
    %3 = tpu.matmul %1, %2, %cst {dimension_numbers = #tpu.dot_dimension_numbers<[1], [0], [0], [1], [0, 0, 1, 1], [], []>} : vector<8x32xbf16>, vector<32x64xbf16>, vector<8x64xf32> -> vector<8x64xf32>
    %c0_3 = arith.constant 0 : index
    %c0_4 = arith.constant 0 : index
    %4 = vector.load %arg3[%c0_3, %c0_4] : memref<1x64xf32, #tpu.memory_space<vmem>>, vector<1x64xf32>
    %5 = vector.broadcast %4 : vector<1x64xf32> to vector<8x64xf32>
    %6 = arith.addf %3, %5 : vector<8x64xf32>
    %cst_5 = arith.constant 0.000000e+00 : f32
    %7 = vector.broadcast %cst_5 : f32 to vector<8x64xf32>
    %8 = arith.maximumf %6, %7 : vector<8x64xf32>
    %9 = arith.truncf %8 : vector<8x64xf32> to vector<8x64xbf16>
    %c0_6 = arith.constant 0 : index
    %c0_7 = arith.constant 0 : index
    %10 = vector.load %arg4[%c0_6, %c0_7] : memref<64x32xbf16, #tpu.memory_space<vmem>>, vector<64x32xbf16>
    %cst_8 = arith.constant dense<0.000000e+00> : vector<8x32xf32>
    %11 = tpu.matmul %9, %10, %cst_8 {dimension_numbers = #tpu.dot_dimension_numbers<[1], [0], [0], [1], [0, 0, 1, 1], [], []>} : vector<8x64xbf16>, vector<64x32xbf16>, vector<8x32xf32> -> vector<8x32xf32>
    %c0_9 = arith.constant 0 : index
    %c0_10 = arith.constant 0 : index
    %12 = vector.load %arg5[%c0_9, %c0_10] : memref<1x32xf32, #tpu.memory_space<vmem>>, vector<1x32xf32>
    %13 = vector.broadcast %12 : vector<1x32xf32> to vector<8x32xf32>
    %14 = arith.addf %11, %13 : vector<8x32xf32>
    %cst_11 = arith.constant 0.000000e+00 : f32
    %15 = vector.broadcast %cst_11 : f32 to vector<8x32xf32>
    %16 = arith.maximumf %14, %15 : vector<8x32xf32>
    %17 = arith.truncf %16 : vector<8x32xf32> to vector<8x32xbf16>
    %c0_12 = arith.constant 0 : index
    %c0_13 = arith.constant 0 : index
    %18 = vector.load %arg6[%c0_12, %c0_13] : memref<32x8xbf16, #tpu.memory_space<vmem>>, vector<32x8xbf16>
    %cst_14 = arith.constant dense<0.000000e+00> : vector<8x8xf32>
    %19 = tpu.matmul %17, %18, %cst_14 {dimension_numbers = #tpu.dot_dimension_numbers<[1], [0], [0], [1], [0, 0, 1, 1], [], []>} : vector<8x32xbf16>, vector<32x8xbf16>, vector<8x8xf32> -> vector<8x8xf32>
    %c0_15 = arith.constant 0 : index
    %c0_16 = arith.constant 0 : index
    %20 = vector.load %arg7[%c0_15, %c0_16] : memref<8x8xf32, #tpu.memory_space<vmem>>, vector<8x8xf32>
    tpu.vector_store %arg7[%c0_15, %c0_16], %19 {strides = array<i32>} : memref<8x8xf32, #tpu.memory_space<vmem>>, vector<8x8xf32>,
    return
  }
  func.func @transform_0(%arg0: i32) -> (i32, i32) {
    %c0_i32 = arith.constant 0 : i32
    %c0_i32_0 = arith.constant 0 : i32
    return %arg0, %c0_i32 : i32, i32
  }
  func.func @transform_1(%arg0: i32) -> (i32, i32) {
    %c0_i32 = arith.constant 0 : i32
    %c0_i32_0 = arith.constant 0 : i32
    %c0_i32_1 = arith.constant 0 : i32
    return %c0_i32, %c0_i32_0 : i32, i32
  }
  func.func @transform_2(%arg0: i32) -> (i32, i32) {
    %c0_i32 = arith.constant 0 : i32
    %c0_i32_0 = arith.constant 0 : i32
    %c0_i32_1 = arith.constant 0 : i32
    return %c0_i32, %c0_i32_0 : i32, i32
  }
  func.func @transform_3(%arg0: i32) -> (i32, i32) {
    %c0_i32 = arith.constant 0 : i32
    %c0_i32_0 = arith.constant 0 : i32
    %c0_i32_1 = arith.constant 0 : i32
    return %c0_i32, %c0_i32_0 : i32, i32
  }
  func.func @transform_4(%arg0: i32) -> (i32, i32) {
    %c0_i32 = arith.constant 0 : i32
    %c0_i32_0 = arith.constant 0 : i32
    %c0_i32_1 = arith.constant 0 : i32
    return %c0_i32, %c0_i32_0 : i32, i32
  }
  func.func @transform_5(%arg0: i32) -> (i32, i32) {
    %c0_i32 = arith.constant 0 : i32
    %c0_i32_0 = arith.constant 0 : i32
    %c0_i32_1 = arith.constant 0 : i32
    return %c0_i32, %c0_i32_0 : i32, i32
  }
  func.func @transform_6(%arg0: i32) -> (i32, i32) {
    %c0_i32 = arith.constant 0 : i32
    %c0_i32_0 = arith.constant 0 : i32
    return %arg0, %c0_i32 : i32, i32
  }
}

</mosaic_0001>

<bundles_post_ra>
// kernel: he_surv_forward.1
= control target key start
LH: loop header
LB: loop body
LE: loop exit
PB: predicated region body
PF: predicated region fallthrough
CT: control target
= control target key end

     0   :  { %v307_v0 = vmov 0.0   ;;  %vm308_vm0 = vmmov 0   ;;  %vm49_vm1 = vcmask 261120   ;;  %vm134_vm2 = vcmask 523264   ;;  %s385_s1 = inlined_call_operand.vmem [shape: bf16[32,64], index: 1, kind: input, shape index: {}]   ;;  %s386_s0 = inlined_call_operand.vmem [shape: f32[8,32], index: 0, kind: input, shape index: {}]   ;;  %s387_s3 = inlined_call_operand.vmem [shape: bf16[64,32], index: 3, kind: input, shape index: {}]   ;;  %s388_s5 = inlined_call_operand.vmem [shape: bf16[32,8], index: 5, kind: input, shape index: {}]   ;;  %s389_s2 = inlined_call_operand.vmem [shape: f32[1,64], index: 2, kind: input, shape index: {}]   ;;  %s390_s4 = inlined_call_operand.vmem [shape: f32[1,32], index: 4, kind: input, shape index: {}]   ;;  %s391_s6 = inlined_call_operand.vmem [shape: f32[8,8], index: 6, kind: output, shape index: {}]  }
   0x1   :  { %269 = vmatprep.subr.bf16.mxu0 %v307_v0  ;;  %v299_v1 = vld [vmem:[%s385_s1] sm:$0xff]   ;;  %273 = vmatprep.mubr.msk.bf16.mxu0 %vm308_vm0, %v307_v0  ;;  %v300_v2 = vld [vmem:[%s385_s1 + $0x8] sm:$0xff]   ;;  %v303_v7 = vld [vmem:[%s387_s3 + $0x10] sm:$0xff]   ;;  %vm239_vm3 = vcmask 64512  }
   0x2   :  { %277 = vmatprep.subr.bf16.mxu1 %v307_v0  ;;  %285 = vmatprep.mubr.msk.bf16.mxu1 %vm308_vm0, %v307_v0  ;;  %v24_v3 = vld [vmem:[%s386_s0] sm:$0xff]  ;;  %v302_v5 = vld [vmem:[%s387_s3 + $0x8] sm:$0xff]   ;;  %v304_v8 = vld [vmem:[%s387_s3 + $0x18] sm:$0xff]  }
   0x3   :  { %270 = vmatpush3.bf16.msra.mxu0 %v299_v1  ;;  %v301_v4 = vld [vmem:[%s387_s3] sm:$0xff]   ;;  %v25_v6 = vpack.c.bf16 %v24_v3, %v24_v3  ;;  %v306_v18 = vld [vmem:[%s388_s5 + $0x8] sm:$0xff]  }
   0x4   :  { %271 = vmatprep.subr.bf16.mxu0 %v307_v0  ;;  %278 = vmatpush3.bf16.msra.mxu1 %v301_v4  ;;  %v305_v9 = vld [vmem:[%s388_s5] sm:$0xff]  }
   0x5   :  { %279 = vmatprep.subr.bf16.mxu1 %v307_v0  ;;  %v245_v10 = vld [vmem:[%s389_s2] ss:$0 sm:$0xff] }
   0x6   :  { %v249_v19 = vld [vmem:[%s390_s4] ss:$0 sm:$0xff] }
   0x7   :  { %272 = vmatpush3.bf16.msra.mxu0 %v300_v2 }
   0x8   :  { %289 = vmatprep.subr.bf16.mxu0 %v307_v0  ;;  %280 = vmatpush3.bf16.msra.mxu1 %v302_v5 }
   0x9   :  { %281 = vmatprep.subr.bf16.mxu1 %v307_v0 }
   0xa   :  { %274 = vmatmul.mubr.msk.bf16.vlgmr.msra.gmra.mrb[0].mxu0 %vm49_vm1, %v25_v6 }
   0xb   :  { %293 = vmatprep.mubr.msk.bf16.mxu0 %vm308_vm0, %v307_v0  ;;  %290 = vmatpush3.bf16.msra.mxu0 %v305_v9 }
   0xc   :  { %282 = vmatpush3.bf16.msra.mxu1 %v303_v7  ;;  %291 = vmatprep.subr.bf16.mxu0 %v307_v0 }
   0xd   :  { %283 = vmatprep.subr.bf16.mxu1 %v307_v0 }
   0xf   :  { %292 = vmatpush3.bf16.msra.mxu0 %v306_v18 }
  0x10   :  { %284 = vmatpush3.bf16.msra.mxu1 %v304_v8 }
  0xdd   :  { %v87_v11 = vpop.f32.mrb[0].mxu0 }
  0xde   :  { %v88_v12 = vadd.f32 %v245_v10, %v87_v11  ;;  %v275_v13 = vpop.f32.mrb[1].mxu0 }
  0xdf   :  { %v90_v14 = vpop.f32.mrb[2].mxu0 }
  0xe0   :  { %v93_v15 = vmax.f32 %v88_v12, 0.0  ;;  %v276_v16 = vpop.f32.mrb[3].mxu0 }
  0xe2   :  { %v94_v17 = vpack.c.bf16 %v93_v15, %v93_v15 }
  0xe4   :  { %286 = vmatmul.mubr.msk.bf16.vlgmr.msra.gmra.mrb[0].mxu1 %vm134_vm2, %v94_v17 }
 0x1b7   :  { %v172_v20 = vpop.f32.mrb[0].mxu1 }
 0x1b8   :  { %v173_v21 = vadd.f32 %v249_v19, %v172_v20  ;;  %v287_v22 = vpop.f32.mrb[1].mxu1 }
 0x1b9   :  { %v175_v23 = vpop.f32.mrb[2].mxu1 }
 0x1ba   :  { %v178_v24 = vmax.f32 %v173_v21, 0.0  ;;  %v288_v25 = vpop.f32.mrb[3].mxu1 }
 0x1bc   :  { %v179_v26 = vpack.c.bf16 %v178_v24, %v178_v24 }
 0x1be   :  { %294 = vmatmul.mubr.msk.bf16.vlgmr.msra.gmra.mrb[4].mxu0 %vm49_vm1, %v179_v26 }
 0x291   :  { %v233_v27 = vpop.f32.mrb[4].mxu0 }
 0x292   :  { %240 = vst.msk [vmem:[%s391_s6] sm:$0xff] %vm239_vm3, %v233_v27  ;;  %v295_v28 = vpop.f32.mrb[5].mxu0 }
 0x293   :  { %v236_v29 = vpop.f32.mrb[6].mxu0 }
 0x294   :  { %v296_v30 = vpop.f32.mrb[7].mxu0 }

</bundles_post_ra>
